<compile_context>
chip_gen: v7x
topology: tpu7x:2x2x1
jax: 0.10.0
libtpu: 0.0.40
codegen_flags: <defaults>
</compile_context>

<pallas_src>
import math

import jax
import jax.numpy as jnp
from jax.experimental import pallas as pl
from jax.experimental.pallas import tpu as pltpu

_TWO_PI = 2.0 * math.pi


def _fb_linear_kernel(x_ref, w_ref, b_ref, o_ref):
    # x_ref : [F, TM]   time features on sublanes, B*L tokens on lanes
    # w_ref : [C, F]    PyTorch Linear weight layout (no transpose needed)
    # b_ref : [C, 1]    bias column
    # o_ref : [C, TM]
    x_fb = jnp.sin(_TWO_PI * x_ref[...].astype(jnp.float32))            # [F, TM]
    y = jnp.dot(w_ref[...].astype(jnp.float32), x_fb,
                preferred_element_type=jnp.float32)                     # [C, TM]
    o_ref[...] = (y + b_ref[...].astype(jnp.float32)).astype(o_ref.dtype)


def fb_linear(x_mark_enc, weight, bias_2d, *, tile_m=1024):
    """x_mark_enc: [B, L, F]; weight: [C, F] (PyTorch layout); bias_2d: [C, 1]."""
    B, L, F = x_mark_enc.shape
    C = weight.shape[0]
    M = B * L

    # Lane-dense layout: tokens (B*L) on the last (lane) axis.
    x_t = x_mark_enc.reshape(M, F).T                                    # [F, M]

    # Tile M with a lane-aligned tile (multiple of 128), pad M up to a tile multiple.
    tm = min(tile_m, pl.cdiv(M, 128) * 128)
    m_pad = pl.cdiv(M, tm) * tm
    if m_pad != M:
        x_t = jnp.pad(x_t, ((0, 0), (0, m_pad - M)))

    out_t = pl.pallas_call(
        _fb_linear_kernel,
        out_shape=jax.ShapeDtypeStruct((C, m_pad), x_mark_enc.dtype),
        grid_spec=pltpu.PrefetchScalarGridSpec(
            num_scalar_prefetch=0,
            grid=(m_pad // tm,),
            in_specs=[
                pl.BlockSpec((F, tm), lambda i: (0, i)),   # streamed x tile
                pl.BlockSpec((C, F), lambda i: (0, 0)),    # resident weight
                pl.BlockSpec((C, 1), lambda i: (0, 0)),    # resident bias
            ],
            out_specs=pl.BlockSpec((C, tm), lambda i: (0, i)),
        ),
        compiler_params=pltpu.CompilerParams(
            # M tiles are independent -> pipeline + shard across both TCs on v7x.
            dimension_semantics=("parallel",),
        ),
    )(x_t, weight, bias_2d)

    return out_t[:, :M].T.reshape(B, L, C)


class FBLinearPallas:
    """Mirror of the PyTorch Model (freq='h' -> 5 time features)."""

    def __init__(self, freq: str, enc_in: int, key):
        self.freq = freq
        self.channels = enc_in
        if freq == "h":
            in_feats = 5
        elif freq == "t":
            in_feats = 6
        else:
            raise ValueError("Invalid frequency!")
        k_w, k_b = jax.random.split(key)
        # deterministic init, mimicking nn.Linear's uniform(-1/sqrt(in), 1/sqrt(in))
        bound = 1.0 / math.sqrt(in_feats)
        self.weight = jax.random.uniform(
            k_w, (self.channels, in_feats), jnp.float32, -bound, bound)  # [C, F]
        self.bias = jax.random.uniform(
            k_b, (self.channels,), jnp.float32, -bound, bound)           # [C]
        # Pre-cache the layouts the kernel wants (no per-call reshape/transpose).
        self.bias_2d = self.bias.reshape(self.channels, 1)               # [C, 1]

    def __call__(self, x_enc, x_mark_enc, x_dec, x_mark_dec, mask=None):
        return fb_linear(x_mark_enc, self.weight, self.bias_2d)


if __name__ == "__main__":
    key = jax.random.PRNGKey(0)
    k_model, k_xmark, k_xenc = jax.random.split(key, 3)

    B, L, C, F = 2, 8, 4, 5          # freq='h' -> 5 time features, enc_in=4
    model = FBLinearPallas(freq="h", enc_in=C, key=k_model)

    x_mark_enc = jax.random.uniform(k_xmark, (B, L, F), jnp.float32)
    x_enc = jax.random.normal(k_xenc, (B, L, C), jnp.float32)   # unused by forward
    x_dec = None
    x_mark_dec = None

    out = model(x_enc, x_mark_enc, x_dec, x_mark_dec)
    jax.block_until_ready(out)

    # reference check in plain JAX
    ref = jnp.sin(2 * jnp.pi * x_mark_enc) @ model.weight.T + model.bias
    assert out.shape == (B, L, C)
    assert jnp.allclose(out, ref, atol=1e-5), "mismatch vs reference"

    print("KERNEL_OK")
</pallas_src>

<mosaic_0001>
module attributes {stable_mosaic.version = 11 : i64} {
  func.func @_fb_linear_kernel(%arg0: i32, %arg1: memref<5x128xf32, #tpu.memory_space<vmem>>, %arg2: memref<4x5xf32, #tpu.memory_space<vmem>>, %arg3: memref<4x1xf32, #tpu.memory_space<vmem>>, %arg4: memref<4x128xf32, #tpu.memory_space<vmem>>) attributes {dimension_semantics = [#tpu.dimension_semantics<parallel>], iteration_bounds = array<i64: 1>, scalar_prefetch = 0 : i64, scratch_operands = 0 : i64, tpu.core_type = #tpu.core_type<tc>, window_params = [{transform_indices = @transform_0, window_bounds = array<i64: 5, 128>}, {pipeline_mode = #tpu.pipeline_mode<synchronous>, transform_indices = @transform_1, window_bounds = array<i64: 4, 5>}, {pipeline_mode = #tpu.pipeline_mode<synchronous>, transform_indices = @transform_2, window_bounds = array<i64: 4, 1>}, {transform_indices = @transform_3, window_bounds = array<i64: 4, 128>}]} {
    %c0 = arith.constant 0 : index
    %c0_0 = arith.constant 0 : index
    %0 = vector.load %arg1[%c0, %c0_0] : memref<5x128xf32, #tpu.memory_space<vmem>>, vector<5x128xf32>
    %cst = arith.constant 6.28318548 : f32
    %1 = vector.broadcast %cst : f32 to vector<5x128xf32>
    %2 = arith.mulf %1, %0 : vector<5x128xf32>
    %3 = math.sin %2 : vector<5x128xf32>
    %c0_1 = arith.constant 0 : index
    %c0_2 = arith.constant 0 : index
    %4 = vector.load %arg2[%c0_1, %c0_2] : memref<4x5xf32, #tpu.memory_space<vmem>>, vector<4x5xf32>
    %cst_3 = arith.constant dense<0.000000e+00> : vector<4x128xf32>
    %5 = tpu.matmul %4, %3, %cst_3 {dimension_numbers = #tpu.dot_dimension_numbers<[1], [0], [0], [1], [0, 0, 1, 1], [], []>} : vector<4x5xf32>, vector<5x128xf32>, vector<4x128xf32> -> vector<4x128xf32>
    %c0_4 = arith.constant 0 : index
    %c0_5 = arith.constant 0 : index
    %6 = vector.load %arg3[%c0_4, %c0_5] : memref<4x1xf32, #tpu.memory_space<vmem>>, vector<4x1xf32>
    %7 = vector.broadcast %6 : vector<4x1xf32> to vector<4x128xf32>
    %8 = arith.addf %5, %7 : vector<4x128xf32>
    %c0_6 = arith.constant 0 : index
    %c0_7 = arith.constant 0 : index
    %9 = vector.load %arg4[%c0_6, %c0_7] : memref<4x128xf32, #tpu.memory_space<vmem>>, vector<4x128xf32>
    tpu.vector_store %arg4[%c0_6, %c0_7], %8 {strides = array<i32>} : memref<4x128xf32, #tpu.memory_space<vmem>>, vector<4x128xf32>,
    return
  }
  func.func @transform_0(%arg0: i32) -> (i32, i32) {
    %c0_i32 = arith.constant 0 : i32
    %c0_i32_0 = arith.constant 0 : i32
    return %c0_i32, %arg0 : i32, i32
  }
  func.func @transform_1(%arg0: i32) -> (i32, i32) {
    %c0_i32 = arith.constant 0 : i32
    %c0_i32_0 = arith.constant 0 : i32
    %c0_i32_1 = arith.constant 0 : i32
    return %c0_i32, %c0_i32_0 : i32, i32
  }
  func.func @transform_2(%arg0: i32) -> (i32, i32) {
    %c0_i32 = arith.constant 0 : i32
    %c0_i32_0 = arith.constant 0 : i32
    %c0_i32_1 = arith.constant 0 : i32
    return %c0_i32, %c0_i32_0 : i32, i32
  }
  func.func @transform_3(%arg0: i32) -> (i32, i32) {
    %c0_i32 = arith.constant 0 : i32
    %c0_i32_0 = arith.constant 0 : i32
    return %c0_i32, %arg0 : i32, i32
  }
}

</mosaic_0001>

<bundles_post_ra>
// kernel: tpu_custom_call.1
= control target key start
LH: loop header
LB: loop body
LE: loop exit
PB: predicated region body
PF: predicated region fallthrough
CT: control target
= control target key end

     0   :  { %8 = vsyncpa [#allocation3], 0  ;;  %s397_s0 = inlined_call_operand.hbm [shape: f32[5,128], index: 0, kind: input, shape index: {}]   ;;  %s398_s1 = inlined_call_operand.vmem [shape: f32[4,5], index: 1, kind: input, shape index: {}]   ;;  %s399_s2 = inlined_call_operand.vmem [shape: f32[4,1], index: 2, kind: input, shape index: {}]   ;;  %s400_s3 = inlined_call_operand.hbm [shape: f32[4,128], index: 3, kind: output, shape index: {}]  }
   0x1   :  { %9 = vsyncpa [#allocation4], 0  ;;  %s315_s12 = smov [#allocation2]   ;;  %s267_s16 = scalar_lea.hbm %s397_s0, 128 }
   0x2   :  { %s16_s13 = sshll.u32 %s315_s12, 4  ;;  %p268_p0 = scmp.ne.s32.totalorder %s397_s0, %s267_s16  ;;  %s17_s13 = int_to_ptr.vmem [resolvable:$true] %s16_s13 }
   0x3   :  { %p271_p1 = scmp.lt.u32.totalorder %s267_s16, %s397_s0 }
   0x5   :  { %p273_p2 = pnand %p271_p1, %p268_p0 }
   0x7   :  { %276 = shalt.err (!%p273_p2)
}
   0x8   :  { %s277_s21 = scalar_lea.vmem %s17_s13, 128  ;;  %p282_p4 = scmp.lt.s32.totalorder %s17_s13, %s17_s13 }
   0x9   :  { %p278_p3 = scmp.ne.s32.totalorder %s17_s13, %s277_s21  ;;  %p283_p5 = scmp.lt.s32.totalorder %s277_s21, %s277_s21 }
   0xb   :  { %p284_p6 = por %p283_p5, %p282_p4 }
   0xd   :  { %p285_p7 = pnand %p284_p6, %p278_p3 }
   0xf   :  { %288 = shalt.err (!%p285_p7)
}
  0x10   :  { %19 = dma.hbm_to_vmem [thread:$0]  %s397_s0, 128, %s17_s13, [#allocation3]  }
  0x11   :  { %311 = dma.done.wait [#allocation3], 128  }
  0x12   :  { %312 = vsyncadd [#allocation3], 4294967168  ;;  %v316_v0 = vmov 0.0   ;;  %vm317_vm0 = vmmov 0   ;;  %v318_v1 = vmov 0   ;;  %vm144_vm14 = vcmask 1044480  }
  0x13   :  { %242 = vmatprep.subr.mxu0 %v316_v0  ;;  %244 = vmatprep.mubr.msk.f32.mxu0 %vm317_vm0, %v316_v0  ;;  %v27_v2 = vld [vmem:[#allocation2] sm:$0x1f]  ;;  %v319_v16 = vmov 683565275   ;;  %v320_v18 = vmov 2475754826  }
  0x14   :  { %262 = vset.pattern.permute.xlu0 %v318_v1  ;;  %v134_v3 = vld [vmem:[%s399_s2] sm:$0xf]  ;;  %v361_v4 = vmul.f32 6.2831855, %v27_v2  ;;  %v321_v20 = vmov 2131351028  }
  0x15   :  { %137 = vperm.xlu0 %262, %v134_v3   ;;  %v322_v22 = vmov 2102212464   ;;  %v323_v24 = vmov 920167782   ;;  %v324_v31 = vmov 1326507024  }
  0x16   :  { %v32_v5 = vand.u32 2139095040, %v361_v4  ;;  %v29_v7 = vand.u32 2147483647, %v361_v4  ;;  %vm31_vm8 = vcmp.lt.s32.totalorder %v361_v4, 0  ;;  %vm121_vm13 = vweird.f32 %v361_v4  ;;  %s325_s26 = smov [#allocation5]  }
  0x17   :  { %vm140_vm15 = vcmask 39936   ;;  %s225_s27 = sshll.u32 %s325_s26, 4  ;;  %s226_s27 = int_to_ptr.vmem [resolvable:$true] %s225_s27 }
  0x18   :  { %v33_v6 = vshrl.u32 %v32_v5, 23  ;;  %v36_v10 = vand.u32 8388607, %v29_v7  ;;  %vm30_vm9 = vcmp.le.f32.partialorder %v29_v7, 0.7853982  ;;  %s289_s28 = scalar_lea.vmem %s226_s27, 64  ;;  %p294_p9 = scmp.lt.s32.totalorder %s226_s27, %s226_s27 }
  0x19   :  { %p290_p8 = scmp.ne.s32.totalorder %s226_s27, %s289_s28  ;;  %p295_p10 = scmp.lt.s32.totalorder %s289_s28, %s289_s28 }
  0x1a   :  { %v234_v8 = vadd.s32 4294967169, %v33_v6  ;;  %v37_v13 = vor.u32 8388608, %v36_v10 }
  0x1b   :  { %p296_p11 = por %p295_p10, %p294_p9 }
  0x1c   :  { %v39_v9 = vadd.s32 1, %v234_v8  ;;  %v77_v33 = vshll.u32 %v37_v13, 8 }
  0x1d   :  { %p297_p12 = pnand %p296_p11, %p290_p8 }
  0x1e   :  { %vm40_vm1 = vcmp.gt.s32.totalorder %v39_v9, 0 }
  0x1f   :  { %v41_v11 = vsel %vm40_vm1, %v39_v9, 0 }
  0x20   :  { %v43_v12 = vand.u32 31, %v41_v11  ;;  %v42_v14 = vshrl.u32 %v41_v11, 5 }
  0x22   :  { %v44_v15 = vsub.s32 32, %v43_v12  ;;  %v46_v17 = vshll.u32 %v319_v16, %v43_v12  ;;  %v49_v19 = vshll.u32 %v320_v18, %v43_v12  ;;  %v52_v21 = vshll.u32 %v321_v20, %v43_v12 }
  0x23   :  { %v55_v23 = vshll.u32 %v322_v22, %v43_v12  ;;  %v58_v25 = vshll.u32 %v323_v24, %v43_v12  ;;  %vm61_vm2 = vcmp.lt.s32.totalorder %v42_v14, 1  ;;  %vm64_vm3 = vcmp.lt.s32.totalorder %v42_v14, 4 }
  0x24   :  { %v45_v26 = vshrl.u32 %v319_v16, %v44_v15  ;;  %v47_v27 = vshrl.u32 %v320_v18, %v44_v15  ;;  %v50_v28 = vshrl.u32 %v321_v20, %v44_v15  ;;  %v53_v29 = vshrl.u32 %v322_v22, %v44_v15 }
  0x25   :  { %v56_v30 = vshrl.u32 %v323_v24, %v44_v15  ;;  %v59_v32 = vshrl.u32 %v324_v31, %v44_v15  ;;  %vm62_vm4 = vcmp.lt.s32.totalorder %v42_v14, 2  ;;  %vm63_vm5 = vcmp.lt.s32.totalorder %v42_v14, 3 }
  0x26   :  { %v48_v34 = vor.u32 %v47_v27, %v46_v17  ;;  %v51_v35 = vor.u32 %v50_v28, %v49_v19  ;;  %v54_v36 = vor.u32 %v53_v29, %v52_v21 }
  0x27   :  { %v57_v37 = vor.u32 %v56_v30, %v55_v23  ;;  %v60_v38 = vor.u32 %v59_v32, %v58_v25  ;;  %v133_v32 = vld [vmem:[%s398_s1] sm:$0xf] }
  0x28   :  { %v65_v39 = vsel %vm61_vm2, %v45_v26, %v48_v34  ;;  %v66_v40 = vsel %vm64_vm3, %v54_v36, 2102212464  ;;  %v69_v41 = vsel %vm61_vm2, %v48_v34, %v51_v35  ;;  %v73_v42 = vsel %vm61_vm2, %v51_v35, %v54_v36 }
  0x29   :  { %v67_v43 = vsel %vm63_vm5, %v51_v35, %v66_v40  ;;  %v70_v44 = vsel %vm64_vm3, %v57_v37, 920167782  ;;  %v74_v45 = vsel %vm64_vm3, %v60_v38, 1326507024 }
  0x2a   :  { %v71_v46 = vsel %vm63_vm5, %v54_v36, %v70_v44  ;;  %v75_v47 = vsel %vm63_vm5, %v57_v37, %v74_v45  ;;  %v68_v48 = vsel %vm62_vm4, %v65_v39, %v67_v43 }
  0x2b   :  { %v72_v49 = vsel %vm62_vm4, %v69_v41, %v71_v46  ;;  %v76_v50 = vsel %vm62_vm4, %v73_v42, %v75_v47  ;;  %v84_v55 = vmul.u32 %v77_v33, %v68_v48 }
  0x2c   :  { %v367_v51 = vmul.u32.u64.low %v77_v33, %v76_v50  ;;  %v368_v52 = vmul.u32.u64.high %v77_v33, %v76_v50, %v367_v51  ;;  %v370_v53 = vmul.u32.u64.low %v77_v33, %v72_v49  ;;  %v371_v54 = vmul.u32.u64.high %v77_v33, %v72_v49, %v370_v53 }
  0x2e   :  { %vm86_vm6 = vc.u32 %v368_v52, %v370_v53  ;;  %v87_v56 = vadd.s32 1, %v371_v54  ;;  %v85_v3 = vadd.s32 %v370_v53, %v368_v52 }
  0x30   :  { %v88_v57 = vsel %vm86_vm6, %v87_v56, %v371_v54 }
  0x31   :  { %v89_v58 = vadd.s32 %v88_v57, %v84_v55 }
  0x33   :  { %v90_v59 = vadd.s32 536870912, %v89_v58 }
  0x35   :  { %v91_v60 = vshrl.u32 %v90_v59, 30 }
  0x37   :  { %v92_v61 = vshll.u32 %v91_v60, 30  ;;  %v115_v17 = vsub.s32 4, %v91_v60 }
  0x39   :  { %v93_v62 = vsub.s32 %v89_v58, %v92_v61  ;;  %v116_v20 = vsel %vm31_vm8, %v115_v17, %v91_v60 }
  0x3a   :  { %v118_v23 = vsel %vm30_vm9, 0, %v116_v20 }
  0x3b   :  { %v95_v63 = vsub.s32 0, %v93_v62  ;;  %v122_v24 = vadd.s32 3, %v118_v23 }
  0x3d   :  { %v235_v0 = vmin.u32 %v95_v63, %v93_v62  ;;  %v123_v25 = vand.u32 3, %v122_v24 }
  0x3f   :  { %v97_v1 = vclz %v235_v0  ;;  %vm128_vm10 = vcmp.eq.s32.totalorder %v123_v25, 2  ;;  %vm125_vm11 = vcmp.eq.s32.totalorder %v123_v25, 0  ;;  %vm124_vm12 = vcmp.lt.s32.totalorder %v123_v25, 2 }
  0x41   :  { %v236_v2 = vadd.s32 4294967294, %v97_v1 }
  0x43   :  { %vm237_vm7 = vcmp.lt.s32.totalorder %v236_v2, 0 }
  0x44   :  { %v100_v5 = vsel %vm237_vm7, 0, %v236_v2 }
  0x45   :  { %v101_v6 = vsub.s32 32, %v100_v5  ;;  %v102_v8 = vshll.u32 %v93_v62, %v100_v5  ;;  %v105_v9 = vsub.s32 4294967266, %v100_v5 }
  0x47   :  { %v103_v10 = vshrl.u32 %v85_v3, %v101_v6  ;;  %v106_v11 = vadd.s32 127, %v105_v9 }
  0x49   :  { %v104_v12 = vor.u32 %v103_v10, %v102_v8  ;;  %v107_v13 = vshll.u32 %v106_v11, 23 }
  0x4b   :  { %v108_v14 = vor.u32 4788187, %v107_v13  ;;  %v111_v15 = vcvt.s32.f32 %v104_v12 }
  0x4d   :  { %v109_v16 = vand.u32 2147483647, %v108_v14 }
  0x4f   :  { %v112_v18 = vmul.f32 %v111_v15, %v109_v16 }
  0x51   :  { %v113_v19 = vxor.u32 2147483648, %v112_v18 }
  0x53   :  { %v114_v21 = vsel %vm31_vm8, %v113_v19, %v112_v18 }
  0x54   :  { %v117_v22 = vsel %vm30_vm9, %v361_v4, %v114_v21 }
  0x55   :  { %263 = vcosq.f32 %v117_v22 }
  0x56   :  { %265 = vsinq.f32 %v117_v22 }
  0x5f   :  { %v264_v26 = vpop.eup %263 }
  0x60   :  { %v266_v27 = vpop.eup %265  ;;  %v129_v28 = vxor.u32 2147483648, %v264_v26 }
  0x61   :  { %v126_v29 = vxor.u32 2147483648, %v266_v27 }
  0x62   :  { %v130_v7 = vsel %vm128_vm10, %v129_v28, %v266_v27 }
  0x63   :  { %v127_v30 = vsel %vm125_vm11, %v264_v26, %v126_v29 }
  0x64   :  { %v131_v31 = vsel %vm124_vm12, %v127_v30, %v130_v7 }
  0x65   :  { %v132_v33 = vsel %vm121_vm13, nan, %v131_v31 }
  0x66   :  { %243 = vmatpush3.msk.msra.mxu0 %vm144_vm14, %v132_v33 }
  0x67   :  { %245 = vmatmul.mubr.msk.f32.vlgmr.msra.gmra.mrb[0].mxu0 %vm140_vm15, %v133_v32 }
  0x94   :  { %v138_v34 = vpop.permute.xlu0 %137 }
 0x13a   :  { %v214_v35 = vpop.f32.mrb[0].mxu0 }
 0x13b   :  { %v215_v36 = vadd.f32 %v214_v35, %v138_v34  ;;  %v246_v37 = vpop.f32.mrb[1].mxu0 }
 0x13d   :  { %218 = vst [vmem:[#allocation5] sm:$0xf] %v215_v36 }
 0x13e   :  { %300 = shalt.err (!%p297_p12)
}
 0x13f   :  { %s301_s30 = scalar_lea.hbm %s400_s3, 64 }
 0x140   :  { %p302_p13 = scmp.ne.s32.totalorder %s400_s3, %s301_s30  ;;  %p305_p0 = scmp.lt.u32.totalorder %s301_s30, %s400_s3 }
 0x142   :  { %p307_p1 = pnand %p305_p0, %p302_p13 }
 0x144   :  { %310 = shalt.err (!%p307_p1)
}
 0x145   :  { %228 = dma.vmem_to_hbm [thread:$0]  %s226_s27, 64, %s400_s3, [#allocation4]  }
 0x146   :  { %313 = dma.done.wait [#allocation4], 64  }
 0x147   :  { %314 = vsyncadd [#allocation4], 4294967232 }
 0x148   :  { %232 = vsyncpa [#allocation3], 1 }
 0x149   :  { %233 = vsyncpa [#allocation4], 1 }

</bundles_post_ra>
